<compile_context>
chip_gen: v6e
topology: v6e:2x2x1
jax: 0.10.0
libtpu: 0.0.40
codegen_flags: <defaults>
</compile_context>

<pallas_src>
import functools

import jax
import jax.numpy as jnp
import numpy as np
from jax.experimental import pallas as pl
from jax.experimental.pallas import tpu as pltpu

_LANES = 128


def _round_up(x, m):
    return ((x + m - 1) // m) * m


def _box_sdf_kernel(params_ref, p_ref, out_ref):
    # params_ref : SMEM (6,)  = [cx, cy, cz, hx, hy, hz]   (h = side_length / 2)
    # p_ref      : VMEM (3, block_rows, 128)  SoA point components (lane-dense)
    # out_ref    : VMEM (block_rows, 128)     signed distance per point
    cx = params_ref[0]
    cy = params_ref[1]
    cz = params_ref[2]
    hx = params_ref[3]
    hy = params_ref[4]
    hz = params_ref[5]

    dx = jnp.abs(p_ref[0] - cx) - hx
    dy = jnp.abs(p_ref[1] - cy) - hy
    dz = jnp.abs(p_ref[2] - cz) - hz

    qx = jnp.maximum(dx, 0.0)
    qy = jnp.maximum(dy, 0.0)
    qz = jnp.maximum(dz, 0.0)
    norm = jnp.sqrt(qx * qx + qy * qy + qz * qz)          # EUP sqrt (free slot)

    mx = jnp.maximum(jnp.maximum(dx, dy), dz)             # explicit, no XLU reduce
    out_ref[...] = norm + jnp.minimum(mx, 0.0)


def _box_sdf_dense(p_soa, params, block_rows):
    # p_soa : (3, rows_pad, 128) f32, params : (6,) f32
    _, rows, lanes = p_soa.shape
    grid = (pl.cdiv(rows, block_rows),)                    # partial last block OK
    n_elems = rows * lanes
    return pl.pallas_call(
        _box_sdf_kernel,
        out_shape=jax.ShapeDtypeStruct((rows, lanes), jnp.float32),
        grid_spec=pltpu.PrefetchScalarGridSpec(
            num_scalar_prefetch=0,
            grid=grid,
            in_specs=[
                pl.BlockSpec(memory_space=pltpu.MemorySpace.SMEM),  # params (6,)
                pl.BlockSpec((3, block_rows, lanes), lambda i: (0, i, 0)),
            ],
            out_specs=pl.BlockSpec((block_rows, lanes), lambda i: (i, 0)),
        ),
        compiler_params=pltpu.CompilerParams(
            dimension_semantics=("parallel",)),
        cost_estimate=pl.CostEstimate(
            flops=20 * n_elems,
            transcendentals=n_elems,
            bytes_accessed=16 * n_elems),
    )(params, p_soa)


@functools.partial(jax.jit, static_argnames=("block_rows", "column_output"))
def box_sdf(points, center, side_lengths, *, block_rows=2048,
            column_output=True):
    """Pallas implementation of BoxSDF.forward.

    points:       any shape (..., 3) (matches points.view(-1, 3))
    center:       (1, 3) float32 parameter
    side_lengths: (1, 3) float32 parameter
    returns:      (N, 1) float32 signed distances (or flat (N,) if
                  column_output=False), N = prod(points.shape[:-1])
    """
    pts = points.reshape(-1, 3).astype(jnp.float32)        # (N, 3)
    n = pts.shape[0]

    rows = pl.cdiv(n, _LANES)                              # 128 points per row
    rows_pad = _round_up(max(rows, 1), 8)                  # pad only to 8 rows
    n_pad = rows_pad * _LANES
    if n_pad != n:
        pts = jnp.pad(pts, ((0, n_pad - n), (0, 0)))       # <= 1023 dummy points

    # Single AoS (N,3) -> SoA (3, rows_pad, 128) relayout pass.
    p_soa = pts.T.reshape(3, rows_pad, _LANES)

    # Block-size selection: largest block that fits, multiple of 8 rows.
    br = min(block_rows, rows_pad)
    # v7x: guarantee >= 2 grid steps so both TensorCores get work (256 floor).
    if pl.cdiv(rows_pad, br) < 2:
        half = _round_up(pl.cdiv(br, 2), 8)
        if half >= 256:
            br = half

    params = jnp.concatenate(
        [center.reshape(3).astype(jnp.float32),
         (side_lengths.reshape(3) / 2.0).astype(jnp.float32)])   # (6,)

    out2d = _box_sdf_dense(p_soa, params, br)              # (rows_pad, 128)
    out_flat = out2d.reshape(n_pad)[:n]                    # (N,)
    if column_output:
        return out_flat[:, None]                           # (N, 1) PyTorch semantics
    return out_flat


def _box_sdf_ref(points, center, side_lengths):
    """Pure-JAX reference mirroring the PyTorch forward exactly."""
    pts = points.reshape(-1, 3)
    diff = jnp.abs(pts - center) - side_lengths / 2.0
    sd = jnp.linalg.norm(jnp.maximum(diff, 0.0), axis=-1) + jnp.minimum(
        jnp.max(diff, axis=-1), 0.0)
    return sd[:, None]


if __name__ == "__main__":
    key = jax.random.PRNGKey(0)

    # Small shapes: 4 x 1024 query points in 3D -> N = 4096.
    points = jax.random.normal(key, (4, 1024, 3), dtype=jnp.float32) * 2.0

    # Deterministic "parameters" (cfg.center.val / cfg.side_lengths.val),
    # stored with the same (1, 3) unsqueeze(0) shape as the PyTorch module.
    center = jnp.array([[0.1, -0.2, 0.3]], dtype=jnp.float32)
    side_lengths = jnp.array([[1.0, 1.5, 2.0]], dtype=jnp.float32)

    out = box_sdf(points, center, side_lengths)
    out = jax.block_until_ready(out)

    ref = _box_sdf_ref(points, center, side_lengths)
    assert out.shape == (4096, 1), out.shape
    np.testing.assert_allclose(np.asarray(out), np.asarray(ref),
                               rtol=1e-5, atol=1e-5)

    # Also exercise an unaligned point count (partial boundary block path).
    pts2 = jax.random.normal(jax.random.PRNGKey(1), (3000, 3),
                             dtype=jnp.float32)
    out2 = jax.block_until_ready(box_sdf(pts2, center, side_lengths))
    ref2 = _box_sdf_ref(pts2, center, side_lengths)
    np.testing.assert_allclose(np.asarray(out2), np.asarray(ref2),
                               rtol=1e-5, atol=1e-5)

    print("KERNEL_OK")
</pallas_src>

<mosaic_0001>
module attributes {stable_mosaic.version = 11 : i64} {
  func.func @_box_sdf_kernel(%arg0: i32, %arg1: memref<6xf32, #tpu.memory_space<smem>>, %arg2: memref<3x32x128xf32, #tpu.memory_space<vmem>>, %arg3: memref<32x128xf32, #tpu.memory_space<vmem>>) attributes {dimension_semantics = [#tpu.dimension_semantics<parallel>], iteration_bounds = array<i64: 1>, scalar_prefetch = 0 : i64, scratch_operands = 0 : i64, tpu.core_type = #tpu.core_type<tc>, window_params = [{transform_indices = @transform_0, window_bounds = array<i64: 6>}, {transform_indices = @transform_1, window_bounds = array<i64: 3, 32, 128>}, {transform_indices = @transform_2, window_bounds = array<i64: 32, 128>}]} {
    %c0 = arith.constant 0 : index
    %0 = memref.load %arg1[%c0] : memref<6xf32, #tpu.memory_space<smem>>
    %c1 = arith.constant 1 : index
    %1 = memref.load %arg1[%c1] : memref<6xf32, #tpu.memory_space<smem>>
    %c2 = arith.constant 2 : index
    %2 = memref.load %arg1[%c2] : memref<6xf32, #tpu.memory_space<smem>>
    %c3 = arith.constant 3 : index
    %3 = memref.load %arg1[%c3] : memref<6xf32, #tpu.memory_space<smem>>
    %c4 = arith.constant 4 : index
    %4 = memref.load %arg1[%c4] : memref<6xf32, #tpu.memory_space<smem>>
    %c5 = arith.constant 5 : index
    %5 = memref.load %arg1[%c5] : memref<6xf32, #tpu.memory_space<smem>>
    %c0_0 = arith.constant 0 : index
    %c0_1 = arith.constant 0 : index
    %c0_2 = arith.constant 0 : index
    %6 = vector.load %arg2[%c0_0, %c0_1, %c0_2] : memref<3x32x128xf32, #tpu.memory_space<vmem>>, vector<1x32x128xf32>
    %7 = vector.shape_cast %6 : vector<1x32x128xf32> to vector<32x128xf32>
    %8 = vector.broadcast %0 : f32 to vector<32x128xf32>
    %9 = arith.subf %7, %8 : vector<32x128xf32>
    %10 = math.absf %9 : vector<32x128xf32>
    %11 = vector.broadcast %3 : f32 to vector<32x128xf32>
    %12 = arith.subf %10, %11 : vector<32x128xf32>
    %c1_3 = arith.constant 1 : index
    %c0_4 = arith.constant 0 : index
    %c0_5 = arith.constant 0 : index
    %13 = vector.load %arg2[%c1_3, %c0_4, %c0_5] : memref<3x32x128xf32, #tpu.memory_space<vmem>>, vector<1x32x128xf32>
    %14 = vector.shape_cast %13 : vector<1x32x128xf32> to vector<32x128xf32>
    %15 = vector.broadcast %1 : f32 to vector<32x128xf32>
    %16 = arith.subf %14, %15 : vector<32x128xf32>
    %17 = math.absf %16 : vector<32x128xf32>
    %18 = vector.broadcast %4 : f32 to vector<32x128xf32>
    %19 = arith.subf %17, %18 : vector<32x128xf32>
    %c2_6 = arith.constant 2 : index
    %c0_7 = arith.constant 0 : index
    %c0_8 = arith.constant 0 : index
    %20 = vector.load %arg2[%c2_6, %c0_7, %c0_8] : memref<3x32x128xf32, #tpu.memory_space<vmem>>, vector<1x32x128xf32>
    %21 = vector.shape_cast %20 : vector<1x32x128xf32> to vector<32x128xf32>
    %22 = vector.broadcast %2 : f32 to vector<32x128xf32>
    %23 = arith.subf %21, %22 : vector<32x128xf32>
    %24 = math.absf %23 : vector<32x128xf32>
    %25 = vector.broadcast %5 : f32 to vector<32x128xf32>
    %26 = arith.subf %24, %25 : vector<32x128xf32>
    %cst = arith.constant 0.000000e+00 : f32
    %27 = vector.broadcast %cst : f32 to vector<32x128xf32>
    %28 = arith.maximumf %12, %27 : vector<32x128xf32>
    %cst_9 = arith.constant 0.000000e+00 : f32
    %29 = vector.broadcast %cst_9 : f32 to vector<32x128xf32>
    %30 = arith.maximumf %19, %29 : vector<32x128xf32>
    %cst_10 = arith.constant 0.000000e+00 : f32
    %31 = vector.broadcast %cst_10 : f32 to vector<32x128xf32>
    %32 = arith.maximumf %26, %31 : vector<32x128xf32>
    %33 = arith.mulf %28, %28 : vector<32x128xf32>
    %34 = arith.mulf %30, %30 : vector<32x128xf32>
    %35 = arith.addf %33, %34 : vector<32x128xf32>
    %36 = arith.mulf %32, %32 : vector<32x128xf32>
    %37 = arith.addf %35, %36 : vector<32x128xf32>
    %38 = math.sqrt %37 : vector<32x128xf32>
    %39 = arith.maximumf %12, %19 : vector<32x128xf32>
    %40 = arith.maximumf %39, %26 : vector<32x128xf32>
    %cst_11 = arith.constant 0.000000e+00 : f32
    %41 = vector.broadcast %cst_11 : f32 to vector<32x128xf32>
    %42 = arith.minimumf %40, %41 : vector<32x128xf32>
    %43 = arith.addf %38, %42 : vector<32x128xf32>
    %c0_12 = arith.constant 0 : index
    %c0_13 = arith.constant 0 : index
    %44 = vector.load %arg3[%c0_12, %c0_13] : memref<32x128xf32, #tpu.memory_space<vmem>>, vector<32x128xf32>
    tpu.vector_store %arg3[%c0_12, %c0_13], %43 {strides = array<i32>} : memref<32x128xf32, #tpu.memory_space<vmem>>, vector<32x128xf32>,
    return
  }
  func.func @transform_0(%arg0: i32) -> i32 {
    %c0_i32 = arith.constant 0 : i32
    %c0_i32_0 = arith.constant 0 : i32
    return %c0_i32 : i32
  }
  func.func @transform_1(%arg0: i32) -> (i32, i32, i32) {
    %c0_i32 = arith.constant 0 : i32
    %c0_i32_0 = arith.constant 0 : i32
    %c0_i32_1 = arith.constant 0 : i32
    return %c0_i32, %arg0, %c0_i32_0 : i32, i32, i32
  }
  func.func @transform_2(%arg0: i32) -> (i32, i32) {
    %c0_i32 = arith.constant 0 : i32
    %c0_i32_0 = arith.constant 0 : i32
    return %arg0, %c0_i32 : i32, i32
  }
}

</mosaic_0001>

<bundles_post_ra>
// kernel: box_sdf.1
= control target key start
LH: loop header
LB: loop body
LE: loop exit
PB: predicated region body
PF: predicated region fallthrough
CT: control target
= control target key end

     0   :  { %7 = vsyncpa [#allocation4], 0  ;;  %s326_s0 = inlined_call_operand.vmem [shape: f32[6], index: 0, kind: input, shape index: {}]   ;;  %s327_s1 = inlined_call_operand.vmem [shape: f32[3,32,128], index: 1, kind: input, shape index: {}]   ;;  %s328_s2 = inlined_call_operand.hbm [shape: f32[32,128], index: 2, kind: output, shape index: {}]  }
   0x1   :  { %8 = vsyncpa [#allocation3], 0  ;;  %s15_s11 = sshll.u32 %s326_s0, 4  ;;  %s16_s11 = int_to_ptr.vmem [resolvable:$true] %s15_s11 }
   0x2   :  { %s209_s12 = scalar_lea.vmem %s16_s11, 16  ;;  %p214_p1 = scmp.lt.s32.totalorder %s16_s11, %s16_s11 }
   0x3   :  { %p210_p0 = scmp.ne.s32.totalorder %s16_s11, %s209_s12  ;;  %p215_p2 = scmp.lt.s32.totalorder %s209_s12, %s209_s12 }
   0x5   :  { %p216_p3 = por %p215_p2, %p214_p1 }
   0x7   :  { %p217_p4 = pnand %p216_p3, %p210_p0 }
   0x9   :  { %220 = shalt.err (!%p217_p4)
}
   0xa   :  { %s245_s13 = smov [#allocation2]  }
   0xb   :  { %18 = dma.vmem_to_smem %s16_s11, 16, %s245_s13, [#allocation4]  }
   0xc   :  { %241 = dma.done.wait [#allocation4], 16  }
   0xd   :  { %242 = vsyncadd [#allocation4], 4294967280 }
   0xe   :  { %24 = sfence }
   0xf   :  { %s25_s14 = sld [smem:[#allocation2]]  ;;  %v31_v0 = vld [vmem:[%s327_s1] sm:$0xff]  ;;  %v32_v1 = vld [vmem:[%s327_s1 + $0x8] sm:$0xff]  ;;  %v33_v2 = vld [vmem:[%s327_s1 + $0x10] sm:$0xff] }
  0x10   :  { %s184_s15 = sld [smem:[#allocation2 + $0x1]]  ;;  %v189_v3 = vld [vmem:[%s327_s1 + $0x20] sm:$0xff]  ;;  %v190_v4 = vld [vmem:[%s327_s1 + $0x28] sm:$0xff]  ;;  %v191_v5 = vld [vmem:[%s327_s1 + $0x30] sm:$0xff] }
  0x11   :  { %s185_s16 = sld [smem:[#allocation2 + $0x2]]  ;;  %v193_v7 = vld [vmem:[%s327_s1 + $0x40] sm:$0xff]  ;;  %v194_v11 = vld [vmem:[%s327_s1 + $0x48] sm:$0xff]  ;;  %v195_v46 = vld [vmem:[%s327_s1 + $0x50] sm:$0xff] }
  0x12   :  { %s186_s17 = sld [smem:[#allocation2 + $0x3]]  ;;  %v34_v50 = vld [vmem:[%s327_s1 + $0x18] sm:$0xff] }
  0x13   :  { %s187_s18 = sld [smem:[#allocation2 + $0x4]]  ;;  %v192_v54 = vld [vmem:[%s327_s1 + $0x38] sm:$0xff] }
  0x14   :  { %s188_s24 = sld [smem:[#allocation2 + $0x5]] }
  0x15   :  { %v285_v6 = vstv %s25_s14 }
  0x16   :  { %v36_v8 = vsub.f32 %v31_v0, %v285_v6  ;;  %v54_v9 = vstv %s184_s15  ;;  %v37_v10 = vsub.f32 %v32_v1, %v285_v6  ;;  %v38_v12 = vsub.f32 %v33_v2, %v285_v6  ;;  %v196_v1 = vld [vmem:[%s327_s1 + $0x58] sm:$0xff]  ;;  %s246_s1 = smov [#allocation5]  }
  0x17   :  { %v55_v13 = vsub.f32 %v189_v3, %v54_v9  ;;  %v296_v14 = vstv %s185_s16  ;;  %v56_v15 = vsub.f32 %v190_v4, %v54_v9  ;;  %v57_v16 = vsub.f32 %v191_v5, %v54_v9  ;;  %s172_s15 = sshll.u32 %s246_s1, 4  ;;  %s173_s15 = int_to_ptr.vmem [resolvable:$true] %s172_s15 }
  0x18   :  { %v40_v17 = vand.u32 2147483647, %v36_v8  ;;  %v44_v18 = vstv %s186_s17  ;;  %v74_v19 = vsub.f32 %v193_v7, %v296_v14  ;;  %v41_v20 = vand.u32 2147483647, %v37_v10  ;;  %s221_s16 = scalar_lea.vmem %s173_s15, 512  ;;  %p226_p6 = scmp.lt.s32.totalorder %s173_s15, %s173_s15 }
  0x19   :  { %v59_v21 = vand.u32 2147483647, %v55_v13  ;;  %v63_v22 = vstv %s187_s18  ;;  %v60_v23 = vand.u32 2147483647, %v56_v15  ;;  %v75_v24 = vsub.f32 %v194_v11, %v296_v14  ;;  %p222_p5 = scmp.ne.s32.totalorder %s173_s15, %s221_s16  ;;  %p227_p7 = scmp.lt.s32.totalorder %s221_s16, %s221_s16 }
  0x1a   :  { %v45_v25 = vsub.f32 %v40_v17, %v44_v18  ;;  %v78_v26 = vand.u32 2147483647, %v74_v19  ;;  %v82_v27 = vstv %s188_s24  ;;  %v46_v28 = vsub.f32 %v41_v20, %v44_v18 }
  0x1b   :  { %v64_v29 = vsub.f32 %v59_v21, %v63_v22  ;;  %v65_v30 = vsub.f32 %v60_v23, %v63_v22  ;;  %v79_v31 = vand.u32 2147483647, %v75_v24  ;;  %v42_v32 = vand.u32 2147483647, %v38_v12  ;;  %p228_p8 = por %p227_p7, %p226_p6 }
  0x1c   :  { %v83_v33 = vsub.f32 %v78_v26, %v82_v27  ;;  %v87_v34 = vmax.f32 %v45_v25, 0.0  ;;  %v88_v35 = vmax.f32 %v46_v28, 0.0  ;;  %v61_v36 = vand.u32 2147483647, %v57_v16 }
  0x1d   :  { %v91_v37 = vmax.f32 %v64_v29, 0.0  ;;  %v84_v38 = vsub.f32 %v79_v31, %v82_v27  ;;  %v92_v39 = vmax.f32 %v65_v30, 0.0  ;;  %v303_v48 = vsub.f32 %v42_v32, %v44_v18  ;;  %p229_p9 = pnand %p228_p8, %p222_p5 }
  0x1e   :  { %v95_v40 = vmax.f32 %v83_v33, 0.0  ;;  %v99_v41 = vmul.f32 %v87_v34, %v87_v34  ;;  %v100_v42 = vmul.f32 %v88_v35, %v88_v35  ;;  %v305_v49 = vsub.f32 %v61_v36, %v63_v22 }
  0x1f   :  { %v103_v43 = vmul.f32 %v91_v37, %v91_v37  ;;  %v96_v44 = vmax.f32 %v84_v38, 0.0  ;;  %v104_v45 = vmul.f32 %v92_v39, %v92_v39  ;;  %v76_v55 = vsub.f32 %v195_v46, %v296_v14 }
  0x20   :  { %v111_v47 = vmul.f32 %v95_v40, %v95_v40  ;;  %v89_v56 = vmax.f32 %v303_v48, 0.0  ;;  %v93_v57 = vmax.f32 %v305_v49, 0.0  ;;  %v39_v60 = vsub.f32 %v34_v50, %v285_v6 }
  0x21   :  { %v107_v51 = vadd.f32 %v103_v43, %v99_v41  ;;  %v108_v52 = vadd.f32 %v104_v45, %v100_v42  ;;  %v112_v53 = vmul.f32 %v96_v44, %v96_v44  ;;  %v80_v61 = vand.u32 2147483647, %v76_v55 }
  0x22   :  { %v58_v62 = vsub.f32 %v192_v54, %v54_v9  ;;  %v101_v63 = vmul.f32 %v89_v56, %v89_v56  ;;  %v105_v0 = vmul.f32 %v93_v57, %v93_v57  ;;  %v43_v3 = vand.u32 2147483647, %v39_v60 }
  0x23   :  { %v115_v58 = vadd.f32 %v111_v47, %v107_v51  ;;  %v116_v59 = vadd.f32 %v112_v53, %v108_v52  ;;  %v85_v2 = vsub.f32 %v80_v61, %v82_v27  ;;  %v77_v5 = vsub.f32 %v196_v1, %v296_v14 }
  0x24   :  { %v62_v4 = vand.u32 2147483647, %v58_v62  ;;  %v109_v8 = vadd.f32 %v105_v0, %v101_v63  ;;  %v48_v10 = vsub.f32 %v43_v3, %v44_v18  ;;  %v147_v6 = vmax.f32 %v45_v25, %v64_v29 }
  0x25   :  { %201 = vrsqrt.f32 %v115_v58  ;;  %v97_v7 = vmax.f32 %v85_v2, 0.0  ;;  %v81_v12 = vand.u32 2147483647, %v77_v5  ;;  %v148_v16 = vmax.f32 %v46_v28, %v65_v30 }
  0x26   :  { %203 = vrsqrt.f32 %v116_v59  ;;  %v67_v11 = vsub.f32 %v62_v4, %v63_v22  ;;  %v90_v13 = vmax.f32 %v48_v10, 0.0  ;;  %v151_v23 = vmax.f32 %v147_v6, %v83_v33 }
  0x27   :  { %v113_v9 = vmul.f32 %v97_v7, %v97_v7  ;;  %v86_v17 = vsub.f32 %v81_v12, %v82_v27  ;;  %v152_v26 = vmax.f32 %v148_v16, %v84_v38  ;;  %vm121_vm0 = vcmp.eq.f32.partialorder %v115_v58, inf }
  0x28   :  { %v94_v15 = vmax.f32 %v67_v11, 0.0  ;;  %v102_v20 = vmul.f32 %v90_v13, %v90_v13  ;;  %v124_v18 = vand.u32 2147483648, %v115_v58  ;;  %v155_v22 = vmin.f32 %v151_v23, 0.0 }
  0x29   :  { %v117_v19 = vadd.f32 %v113_v9, %v109_v8  ;;  %v98_v24 = vmax.f32 %v86_v17, 0.0  ;;  %vm123_vm1 = vcmp.eq.f32.partialorder %v115_v58, 0.0  ;;  %vm128_vm2 = vcmp.eq.f32.partialorder %v116_v59, inf }
  0x2a   :  { %v106_v21 = vmul.f32 %v94_v15, %v94_v15  ;;  %v131_v28 = vand.u32 2147483648, %v116_v59  ;;  %vm130_vm3 = vcmp.eq.f32.partialorder %v116_v59, 0.0  ;;  %v156_v30 = vmin.f32 %v152_v26, 0.0 }
  0x2b   :  { %205 = vrsqrt.f32 %v117_v19  ;;  %v114_v14 = vmul.f32 %v98_v24, %v98_v24  ;;  %v149_v35 = vmax.f32 %v303_v48, %v305_v49  ;;  %v150_v42 = vmax.f32 %v48_v10, %v67_v11 }
  0x2c   :  { %v110_v31 = vadd.f32 %v106_v21, %v102_v20  ;;  %vm135_vm4 = vcmp.eq.f32.partialorder %v117_v19, inf  ;;  %v138_v44 = vand.u32 2147483648, %v117_v19  ;;  %vm137_vm5 = vcmp.eq.f32.partialorder %v117_v19, 0.0 }
  0x2d   :  { %v153_v41 = vmax.f32 %v149_v35, %v85_v2  ;;  %v154_v47 = vmax.f32 %v150_v42, %v86_v17 }
  0x2e   :  { %v118_v25 = vadd.f32 %v114_v14, %v110_v31 }
  0x2f   :  { %v157_v46 = vmin.f32 %v153_v41, 0.0  ;;  %v158_v54 = vmin.f32 %v154_v47, 0.0 }
  0x30   :  { %207 = vrsqrt.f32 %v118_v25  ;;  %vm142_vm6 = vcmp.eq.f32.partialorder %v118_v25, inf  ;;  %v145_v49 = vand.u32 2147483648, %v118_v25  ;;  %vm144_vm7 = vcmp.eq.f32.partialorder %v118_v25, 0.0 }
  0x32   :  { %v202_v32 = vpop.eup %201 }
  0x33   :  { %v204_v29 = vpop.eup %203  ;;  %v120_v34 = vmul.f32 %v202_v32, %v115_v58 }
  0x34   :  { %v127_v27 = vmul.f32 %v204_v29, %v116_v59 }
  0x35   :  { %v122_v33 = vsel %vm121_vm0, %v115_v58, %v120_v34 }
  0x36   :  { %v125_v36 = vsel %vm123_vm1, %v124_v18, %v122_v33  ;;  %v129_v37 = vsel %vm128_vm2, %v116_v59, %v127_v27 }
  0x37   :  { %v159_v38 = vadd.f32 %v155_v22, %v125_v36  ;;  %v132_v39 = vsel %vm130_vm3, %v131_v28, %v129_v37 }
  0x38   :  { %v160_v40 = vadd.f32 %v156_v30, %v132_v39  ;;  %v206_v43 = vpop.eup %205 }
  0x39   :  { %163 = vst [vmem:[#allocation5] sm:$0xff] %v159_v38  ;;  %v134_v45 = vmul.f32 %v206_v43, %v117_v19 }
  0x3a   :  { %164 = vst [vmem:[#allocation5 + $0x8] sm:$0xff] %v160_v40 }
  0x3b   :  { %v136_v50 = vsel %vm135_vm4, %v117_v19, %v134_v45 }
  0x3c   :  { %v139_v51 = vsel %vm137_vm5, %v138_v44, %v136_v50 }
  0x3d   :  { %v208_v52 = vpop.eup %207  ;;  %v161_v48 = vadd.f32 %v157_v46, %v139_v51 }
  0x3e   :  { %v141_v53 = vmul.f32 %v208_v52, %v118_v25 }
  0x3f   :  { %165 = vst [vmem:[#allocation5 + $0x10] sm:$0xff] %v161_v48 }
  0x40   :  { %v143_v55 = vsel %vm142_vm6, %v118_v25, %v141_v53 }
  0x41   :  { %v146_v56 = vsel %vm144_vm7, %v145_v49, %v143_v55 }
  0x42   :  { %v162_v57 = vadd.f32 %v158_v54, %v146_v56 }
  0x44   :  { %166 = vst [vmem:[#allocation5 + $0x18] sm:$0xff] %v162_v57 }
  0x45   :  { %232 = shalt.err (!%p229_p9)
}
  0x46   :  { %s247_s17 = smov 128   ;;  %s248_s18 = smov 8  }
  0x47   :  { %178 = dma.vmem_to_hbm [thread:$0]  %s173_s15, 512, %s328_s2, [#allocation3], %s247_s17, %s247_s17, %s248_s18  }
  0x48   :  { %243 = dma.done.wait [#allocation3], 512  }
  0x49   :  { %244 = vsyncadd [#allocation3], 4294966784 }
  0x4a   :  { %182 = vsyncpa [#allocation3], 1 }
  0x4b   :  { %183 = vsyncpa [#allocation4], 1 }

</bundles_post_ra>
